<compile_context>
chip_gen: v5e
topology: v5e:2x2
jax: 0.10.0
libtpu: 0.0.40
codegen_flags: <defaults>
</compile_context>

<pallas_src>
import jax
import jax.numpy as jnp
from jax.experimental import pallas as pl
from jax.experimental.pallas import tpu as pltpu

HIDDEN = 64      # logical hidden width of FeedForwardNN
H_PAD = 128      # lane-padded hidden width (constant ones-lane lives at index HIDDEN)
MAX_TM = 4096    # max batch-tile rows (multiple of 8); tiny per-tile VMEM at 8-lane I/O
MIN_SPLIT_BATCH = 256  # force grid >= 2 above this batch so both v7x TCs get work


def _round_up(x, m):
    return (x + m - 1) // m * m


def _mlp_kernel(x_ref, w1_ref, w2_ref, w3_ref, o_ref):
    # 3 MXU matmuls + 2 VPU relus. Biases are folded into the weights via the
    # constant ones-lane; accumulation is f32.
    x = x_ref[...]
    h1 = jnp.maximum(
        jnp.dot(x, w1_ref[...], preferred_element_type=jnp.float32), 0.0)
    h2 = jnp.maximum(
        jnp.dot(h1.astype(w2_ref.dtype), w2_ref[...],
                preferred_element_type=jnp.float32), 0.0)
    out = jnp.dot(h2.astype(w3_ref.dtype), w3_ref[...],
                  preferred_element_type=jnp.float32)
    o_ref[...] = out.astype(o_ref.dtype)


def _pack_params(params, in_dim, out_dim, compute_dtype):
    """Sublane-pad weights and fold the biases in.

    Row `in_dim` of w1 (resp. row HIDDEN of w2/w3) holds the bias; column
    HIDDEN of w1/w2 regenerates the constant 1.0 lane for the next layer.
    """
    in_pad = _round_up(in_dim + 1, 8)     # small: e.g. 4+1 -> 8 lanes
    out_pad = _round_up(out_dim, 8)       # small: e.g. 2   -> 8 lanes

    w1 = jnp.zeros((in_pad, H_PAD), jnp.float32)
    w1 = w1.at[:in_dim, :HIDDEN].set(params["w1"])
    w1 = w1.at[in_dim, :HIDDEN].set(params["b1"][0])
    w1 = w1.at[in_dim, HIDDEN].set(1.0)           # makes h1[:, HIDDEN] == 1.0

    w2 = jnp.zeros((H_PAD, H_PAD), jnp.float32)
    w2 = w2.at[:HIDDEN, :HIDDEN].set(params["w2"])
    w2 = w2.at[HIDDEN, :HIDDEN].set(params["b2"][0])
    w2 = w2.at[HIDDEN, HIDDEN].set(1.0)           # makes h2[:, HIDDEN] == 1.0

    w3 = jnp.zeros((H_PAD, out_pad), jnp.float32)
    w3 = w3.at[:HIDDEN, :out_dim].set(params["w3"])
    w3 = w3.at[HIDDEN, :out_dim].set(params["b3"][0])

    cd = compute_dtype
    return w1.astype(cd), w2.astype(cd), w3.astype(cd), in_pad, out_pad


def feedforward_nn(x, params, compute_dtype=jnp.float32):
    """Fused 3-layer MLP forward pass as a batch-tiled Pallas TPU kernel.

    x: (batch, in_dim) float32
    params: dict with w1 (in_dim,64), b1 (1,64), w2 (64,64), b2 (1,64),
            w3 (64,out_dim), b3 (1,out_dim)
    compute_dtype: matmul-operand dtype. jnp.float32 is exact (PyTorch
        parity); jnp.bfloat16 halves x/weight DMA bytes and MXU passes and is
        the recommended non-exact mode on v5e/v6e/v7x. Accumulation is f32.
    returns: (batch, out_dim) float32
    """
    batch, in_dim = x.shape
    out_dim = params["w3"].shape[1]

    w1p, w2p, w3p, in_pad, out_pad = _pack_params(
        params, in_dim, out_dim, compute_dtype)

    # Even batch split: minimum number of tiles <= MAX_TM rows each, tile rows
    # a multiple of 8 sublanes, and at least 2 tiles for large batches so the
    # "parallel" grid axis shards across both TensorCores on v7x.
    num_tiles = pl.cdiv(batch, MAX_TM)
    if batch >= MIN_SPLIT_BATCH:
        num_tiles = max(num_tiles, 2)
    tm = _round_up(pl.cdiv(batch, num_tiles), 8)
    padded_batch = num_tiles * tm
    grid = (num_tiles,)

    # Packed input: features, then a constant 1.0 lane (for the folded bias),
    # zeros in the few remaining sublane-pad lanes / padded batch rows.
    xp = jnp.zeros((padded_batch, in_pad), compute_dtype)
    xp = xp.at[:batch, :in_dim].set(x.astype(compute_dtype))
    xp = xp.at[:batch, in_dim].set(1.0)

    out_padded = pl.pallas_call(
        _mlp_kernel,
        out_shape=jax.ShapeDtypeStruct((padded_batch, out_pad), jnp.float32),
        grid_spec=pltpu.PrefetchScalarGridSpec(
            num_scalar_prefetch=0,
            grid=grid,
            in_specs=[
                # last block dim == full array dim -> legal despite < 128 lanes
                pl.BlockSpec((tm, in_pad), lambda i: (i, 0)),      # x tile
                pl.BlockSpec((in_pad, H_PAD), lambda i: (0, 0)),   # resident w1
                pl.BlockSpec((H_PAD, H_PAD), lambda i: (0, 0)),    # resident w2
                pl.BlockSpec((H_PAD, out_pad), lambda i: (0, 0)),  # resident w3
            ],
            out_specs=pl.BlockSpec((tm, out_pad), lambda i: (i, 0)),
        ),
        compiler_params=pltpu.CompilerParams(
            dimension_semantics=("parallel",)),  # megacore sharding on v7x
    )(xp, w1p, w2p, w3p)

    return out_padded[:batch, :out_dim]


def init_params(key, in_dim, out_dim):
    """Deterministic synthetic parameter init (PyTorch-like uniform ranges)."""
    ks = jax.random.split(key, 6)

    def lin(kw, kb, fan_in, fan_out):
        bound = 1.0 / jnp.sqrt(jnp.float32(fan_in))
        w = jax.random.uniform(kw, (fan_in, fan_out), jnp.float32, -bound, bound)
        b = jax.random.uniform(kb, (1, fan_out), jnp.float32, -bound, bound)
        return w, b

    w1, b1 = lin(ks[0], ks[1], in_dim, HIDDEN)
    w2, b2 = lin(ks[2], ks[3], HIDDEN, HIDDEN)
    w3, b3 = lin(ks[4], ks[5], HIDDEN, out_dim)
    return {"w1": w1, "b1": b1, "w2": w2, "b2": b2, "w3": w3, "b3": b3}


def _reference(x, p):
    h1 = jnp.maximum(x @ p["w1"] + p["b1"], 0.0)
    h2 = jnp.maximum(h1 @ p["w2"] + p["b2"], 0.0)
    return h2 @ p["w3"] + p["b3"]


if __name__ == "__main__":
    key = jax.random.PRNGKey(0)
    k_x, k_p, k_x2 = jax.random.split(key, 3)

    # Small shapes consistent with the module (CartPole: obs_dim=4, act_dim=2).
    batch, in_dim, out_dim = 8, 4, 2
    x = jax.random.normal(k_x, (batch, in_dim), jnp.float32)
    params = init_params(k_p, in_dim, out_dim)

    out = feedforward_nn(x, params)
    out = jax.block_until_ready(out)
    ref = _reference(x, params)
    assert out.shape == (batch, out_dim)
    assert jnp.allclose(out, ref, atol=1e-5, rtol=1e-5)

    # Second call with a PPO-sized rollout batch to exercise the multi-tile
    # grid (forced >= 2 tiles), even batch splitting and resident-weight path.
    batch2 = 600  # not a multiple of 8 after the even split -> exercises padding
    x2 = jax.random.normal(k_x2, (batch2, in_dim), jnp.float32)
    out2 = jax.block_until_ready(feedforward_nn(x2, params))
    ref2 = _reference(x2, params)
    assert out2.shape == (batch2, out_dim)
    assert jnp.allclose(out2, ref2, atol=1e-4, rtol=1e-4)

    print("KERNEL_OK")
</pallas_src>

<mosaic_0001>
module attributes {stable_mosaic.version = 11 : i64} {
  func.func @_mlp_kernel(%arg0: i32, %arg1: memref<8x8xf32, #tpu.memory_space<vmem>>, %arg2: memref<8x128xf32, #tpu.memory_space<vmem>>, %arg3: memref<128x128xf32, #tpu.memory_space<vmem>>, %arg4: memref<128x8xf32, #tpu.memory_space<vmem>>, %arg5: memref<8x8xf32, #tpu.memory_space<vmem>>) attributes {dimension_semantics = [#tpu.dimension_semantics<parallel>], iteration_bounds = array<i64: 1>, scalar_prefetch = 0 : i64, scratch_operands = 0 : i64, tpu.core_type = #tpu.core_type<tc>, window_params = [{transform_indices = @transform_0, window_bounds = array<i64: 8, 8>}, {pipeline_mode = #tpu.pipeline_mode<synchronous>, transform_indices = @transform_1, window_bounds = array<i64: 8, 128>}, {pipeline_mode = #tpu.pipeline_mode<synchronous>, transform_indices = @transform_2, window_bounds = array<i64: 128, 128>}, {pipeline_mode = #tpu.pipeline_mode<synchronous>, transform_indices = @transform_3, window_bounds = array<i64: 128, 8>}, {transform_indices = @transform_4, window_bounds = array<i64: 8, 8>}]} {
    %c0 = arith.constant 0 : index
    %c0_0 = arith.constant 0 : index
    %0 = vector.load %arg1[%c0, %c0_0] : memref<8x8xf32, #tpu.memory_space<vmem>>, vector<8x8xf32>
    %c0_1 = arith.constant 0 : index
    %c0_2 = arith.constant 0 : index
    %1 = vector.load %arg2[%c0_1, %c0_2] : memref<8x128xf32, #tpu.memory_space<vmem>>, vector<8x128xf32>
    %cst = arith.constant dense<0.000000e+00> : vector<8x128xf32>
    %2 = tpu.matmul %0, %1, %cst {dimension_numbers = #tpu.dot_dimension_numbers<[1], [0], [0], [1], [0, 0, 1, 1], [], []>} : vector<8x8xf32>, vector<8x128xf32>, vector<8x128xf32> -> vector<8x128xf32>
    %cst_3 = arith.constant 0.000000e+00 : f32
    %3 = vector.broadcast %cst_3 : f32 to vector<8x128xf32>
    %4 = arith.maximumf %2, %3 : vector<8x128xf32>
    %c0_4 = arith.constant 0 : index
    %c0_5 = arith.constant 0 : index
    %5 = vector.load %arg3[%c0_4, %c0_5] : memref<128x128xf32, #tpu.memory_space<vmem>>, vector<128x128xf32>
    %cst_6 = arith.constant dense<0.000000e+00> : vector<8x128xf32>
    %6 = tpu.matmul %4, %5, %cst_6 {dimension_numbers = #tpu.dot_dimension_numbers<[1], [0], [0], [1], [0, 0, 1, 1], [], []>} : vector<8x128xf32>, vector<128x128xf32>, vector<8x128xf32> -> vector<8x128xf32>
    %cst_7 = arith.constant 0.000000e+00 : f32
    %7 = vector.broadcast %cst_7 : f32 to vector<8x128xf32>
    %8 = arith.maximumf %6, %7 : vector<8x128xf32>
    %c0_8 = arith.constant 0 : index
    %c0_9 = arith.constant 0 : index
    %9 = vector.load %arg4[%c0_8, %c0_9] : memref<128x8xf32, #tpu.memory_space<vmem>>, vector<128x8xf32>
    %cst_10 = arith.constant dense<0.000000e+00> : vector<8x8xf32>
    %10 = tpu.matmul %8, %9, %cst_10 {dimension_numbers = #tpu.dot_dimension_numbers<[1], [0], [0], [1], [0, 0, 1, 1], [], []>} : vector<8x128xf32>, vector<128x8xf32>, vector<8x8xf32> -> vector<8x8xf32>
    %c0_11 = arith.constant 0 : index
    %c0_12 = arith.constant 0 : index
    %11 = vector.load %arg5[%c0_11, %c0_12] : memref<8x8xf32, #tpu.memory_space<vmem>>, vector<8x8xf32>
    tpu.vector_store %arg5[%c0_11, %c0_12], %10 {strides = array<i32>} : memref<8x8xf32, #tpu.memory_space<vmem>>, vector<8x8xf32>,
    return
  }
  func.func @transform_0(%arg0: i32) -> (i32, i32) {
    %c0_i32 = arith.constant 0 : i32
    %c0_i32_0 = arith.constant 0 : i32
    return %arg0, %c0_i32 : i32, i32
  }
  func.func @transform_1(%arg0: i32) -> (i32, i32) {
    %c0_i32 = arith.constant 0 : i32
    %c0_i32_0 = arith.constant 0 : i32
    %c0_i32_1 = arith.constant 0 : i32
    return %c0_i32, %c0_i32_0 : i32, i32
  }
  func.func @transform_2(%arg0: i32) -> (i32, i32) {
    %c0_i32 = arith.constant 0 : i32
    %c0_i32_0 = arith.constant 0 : i32
    %c0_i32_1 = arith.constant 0 : i32
    return %c0_i32, %c0_i32_0 : i32, i32
  }
  func.func @transform_3(%arg0: i32) -> (i32, i32) {
    %c0_i32 = arith.constant 0 : i32
    %c0_i32_0 = arith.constant 0 : i32
    %c0_i32_1 = arith.constant 0 : i32
    return %c0_i32, %c0_i32_0 : i32, i32
  }
  func.func @transform_4(%arg0: i32) -> (i32, i32) {
    %c0_i32 = arith.constant 0 : i32
    %c0_i32_0 = arith.constant 0 : i32
    return %arg0, %c0_i32 : i32, i32
  }
}

</mosaic_0001>

<bundles_post_ra>
// kernel: tpu_custom_call.1
= control target key start
LH: loop header
LB: loop body
LE: loop exit
PB: predicated region body
PF: predicated region fallthrough
CT: control target
= control target key end

     0   :  { %9 = vsyncpa [#allocation3], 0  ;;  %s339_s0 = inlined_call_operand.vmem [shape: f32[8,8], index: 0, kind: input, shape index: {}]   ;;  %s340_s1 = inlined_call_operand.hbm [shape: f32[8,128], index: 1, kind: input, shape index: {}]   ;;  %s341_s2 = inlined_call_operand.vmem [shape: f32[128,128], index: 2, kind: input, shape index: {}]   ;;  %s342_s3 = inlined_call_operand.vmem [shape: f32[128,8], index: 3, kind: input, shape index: {}]   ;;  %s343_s4 = inlined_call_operand.hbm [shape: f32[8,8], index: 4, kind: output, shape index: {}]  }
   0x1   :  { %10 = vsyncpa [#allocation4], 0  ;;  %s18_s17 = sshll.u32 %s340_s1, 4  ;;  %s205_s18 = smov [#allocation2]   ;;  %s19_s17 = int_to_ptr.hbm [resolvable:$true] %s18_s17 }
   0x2   :  { %s20_s19 = sshll.u32 %s205_s18, 4  ;;  %s21_s19 = int_to_ptr.vmem [resolvable:$true] %s20_s19 }
   0x3   :  { %23 = dma.hbm_to_vmem [thread:$0]  %s19_s17, 128, %s21_s19, [#allocation3]  }
   0x4   :  { %201 = dma.done.wait [#allocation3], 128  }
   0x5   :  { %202 = vsyncadd [#allocation3], 4294967168  ;;  %vm34_vm0 = vcmask 64512   ;;  %v33_v0 = vld [vmem:[#allocation2] sm:$0xff]  ;;  %v74_v2 = vld [vmem:[%s341_s2 + $0x78] sm:$0xff]  ;;  %s206_s28 = smov [#allocation5]  }
   0x6   :  { %v32_v1 = vld [vmem:[%s339_s0] sm:$0xff]  ;;  %53 = vmatpush.msra.mxu0 %v33_v0  ;;  %75 = vmatpush.msra.mxu1 %v74_v2  ;;  %v73_v3 = vld [vmem:[%s341_s2 + $0x70] sm:$0xff]  ;;  %v72_v4 = vld [vmem:[%s341_s2 + $0x68] sm:$0xff]  ;;  %s138_s0 = sshll.u32 %s206_s28, 4  ;;  %s140_s5 = sshll.u32 %s343_s4, 4  ;;  %s139_s0 = int_to_ptr.vmem [resolvable:$true] %s138_s0  ;;  %s141_s5 = int_to_ptr.hbm [resolvable:$true] %s140_s5 }
   0x7   :  { %150 = vmatmul.msk.f32.vlgmr.msra.gmra.mxu0 %vm34_vm0, %v32_v1  ;;  %v71_v5 = vld [vmem:[%s341_s2 + $0x60] sm:$0xff]  ;;  %v70_v6 = vld [vmem:[%s341_s2 + $0x58] sm:$0xff]  ;;  %v69_v7 = vld [vmem:[%s341_s2 + $0x50] sm:$0xff] }
   0x8   :  { %76 = vmatpush.msra.mxu1 %v73_v3  ;;  %v68_v8 = vld [vmem:[%s341_s2 + $0x48] sm:$0xff]  ;;  %v67_v9 = vld [vmem:[%s341_s2 + $0x40] sm:$0xff]  ;;  %v66_v10 = vld [vmem:[%s341_s2 + $0x38] sm:$0xff] }
   0x9   :  { %v65_v11 = vld [vmem:[%s341_s2 + $0x30] sm:$0xff]  ;;  %v64_v12 = vld [vmem:[%s341_s2 + $0x28] sm:$0xff]  ;;  %v63_v13 = vld [vmem:[%s341_s2 + $0x20] sm:$0xff] }
   0xa   :  { %77 = vmatpush.msra.mxu1 %v72_v4  ;;  %v62_v14 = vld [vmem:[%s341_s2 + $0x18] sm:$0xff]  ;;  %v61_v15 = vld [vmem:[%s341_s2 + $0x10] sm:$0xff]  ;;  %v60_v16 = vld [vmem:[%s341_s2 + $0x8] sm:$0xff] }
   0xb   :  { %v59_v17 = vld [vmem:[%s341_s2] sm:$0xff]  ;;  %v111_v18 = vld [vmem:[%s342_s3 + $0x78] sm:$0xff]  ;;  %v110_v19 = vld [vmem:[%s342_s3 + $0x70] sm:$0xff] }
   0xc   :  { %78 = vmatpush.msra.mxu1 %v71_v5  ;;  %112 = vmatpush.msra.mxu2 %v111_v18  ;;  %v109_v20 = vld [vmem:[%s342_s3 + $0x68] sm:$0xff]  ;;  %v108_v21 = vld [vmem:[%s342_s3 + $0x60] sm:$0xff]  ;;  %v107_v22 = vld [vmem:[%s342_s3 + $0x58] sm:$0xff] }
   0xd   :  { %v106_v23 = vld [vmem:[%s342_s3 + $0x50] sm:$0xff]  ;;  %v105_v24 = vld [vmem:[%s342_s3 + $0x48] sm:$0xff]  ;;  %v104_v25 = vld [vmem:[%s342_s3 + $0x40] sm:$0xff] }
   0xe   :  { %79 = vmatpush.msra.mxu1 %v70_v6  ;;  %113 = vmatpush.msra.mxu2 %v110_v19  ;;  %v103_v26 = vld [vmem:[%s342_s3 + $0x38] sm:$0xff]  ;;  %v102_v27 = vld [vmem:[%s342_s3 + $0x30] sm:$0xff]  ;;  %v101_v28 = vld [vmem:[%s342_s3 + $0x28] sm:$0xff] }
   0xf   :  { %v100_v29 = vld [vmem:[%s342_s3 + $0x20] sm:$0xff]  ;;  %v99_v30 = vld [vmem:[%s342_s3 + $0x18] sm:$0xff]  ;;  %v98_v31 = vld [vmem:[%s342_s3 + $0x10] sm:$0xff] }
  0x10   :  { %80 = vmatpush.msra.mxu1 %v69_v7  ;;  %114 = vmatpush.msra.mxu2 %v109_v20  ;;  %v97_v34 = vld [vmem:[%s342_s3 + $0x8] sm:$0xff]  ;;  %v96_v35 = vld [vmem:[%s342_s3] sm:$0xff] }
  0x12   :  { %81 = vmatpush.msra.mxu1 %v68_v8  ;;  %115 = vmatpush.msra.mxu2 %v108_v21 }
  0x14   :  { %82 = vmatpush.msra.mxu1 %v67_v9  ;;  %116 = vmatpush.msra.mxu2 %v107_v22 }
  0x16   :  { %83 = vmatpush.msra.mxu1 %v66_v10  ;;  %117 = vmatpush.msra.mxu2 %v106_v23 }
  0x18   :  { %84 = vmatpush.msra.mxu1 %v65_v11  ;;  %118 = vmatpush.msra.mxu2 %v105_v24 }
  0x1a   :  { %85 = vmatpush.msra.mxu1 %v64_v12  ;;  %119 = vmatpush.msra.mxu2 %v104_v25 }
  0x1c   :  { %86 = vmatpush.msra.mxu1 %v63_v13  ;;  %120 = vmatpush.msra.mxu2 %v103_v26 }
  0x1e   :  { %87 = vmatpush.msra.mxu1 %v62_v14  ;;  %121 = vmatpush.msra.mxu2 %v102_v27 }
  0x20   :  { %88 = vmatpush.msra.mxu1 %v61_v15  ;;  %122 = vmatpush.msra.mxu2 %v101_v28 }
  0x22   :  { %89 = vmatpush.msra.mxu1 %v60_v16  ;;  %123 = vmatpush.msra.mxu2 %v100_v29 }
  0x24   :  { %90 = vmatpush.msra.mxu1 %v59_v17  ;;  %124 = vmatpush.msra.mxu2 %v99_v30 }
  0x26   :  { %125 = vmatpush.msra.mxu2 %v98_v31 }
  0x28   :  { %126 = vmatpush.msra.mxu2 %v97_v34 }
  0x2a   :  { %127 = vmatpush.msra.mxu2 %v96_v35 }
  0x84   :  { %v55_v32 = vpop.f32.mrf.mxu0 }
  0x85   :  { %v58_v33 = vmax.f32 %v55_v32, 0.0 }
  0x87   :  { %91 = vmatmul.f32.vlgmr.msra.gmra.mxu1 %v58_v33 }
 0x104   :  { %v92_v36 = vpop.f32.mrf.mxu1 }
 0x105   :  { %v95_v37 = vmax.f32 %v92_v36, 0.0 }
 0x107   :  { %128 = vmatmul.f32.vlgmr.msra.gmra.mxu2 %v95_v37 }
 0x18a   :  { %v129_v38 = vpop.f32.mrf.mxu2 }
 0x18b   :  { %132 = vst.msk [vmem:[#allocation5] sm:$0xff] %vm34_vm0, %v129_v38 }
 0x18c   :  { %143 = dma.vmem_to_hbm [thread:$0]  %s139_s0, 128, %s141_s5, [#allocation4]  }
 0x18d   :  { %203 = dma.done.wait [#allocation4], 128  }
 0x18e   :  { %204 = vsyncadd [#allocation4], 4294967168 }
 0x18f   :  { %148 = vsyncpa [#allocation3], 1 }
 0x190   :  { %149 = vsyncpa [#allocation4], 1 }

</bundles_post_ra>
